<compile_context>
chip_gen: v5e
topology: v5e:2x2
jax: 0.10.0
libtpu: 0.0.40
codegen_flags: <defaults>
</compile_context>

<pallas_src>
import functools

import jax
import jax.numpy as jnp
from jax import lax
from jax.experimental import pallas as pl
from jax.experimental.pallas import tpu as pltpu


def _contrastive_kernel(img1_ref, img2_ref, m1_ref, idx2_ref, out_ref, *, margin):
    """One grid step == one batch element (grid axis is parallel).

    img1_ref/img2_ref : (1, C, HW)      f32 VMEM
    m1_ref            : (1, 1, N)       i32 VMEM (flat spatial indices, image-1 matches)
    idx2_ref          : (1, 1, N+M*N)   i32 VMEM (image-2 matches ++ image-2 non-matches)
    out_ref           : (1, 1, 3)       f32 SMEM per-batch partials:
                                        [pos_sq_sum, relu_sum, n_hard]
    """
    img1 = img1_ref[0]                  # (C, HW)
    img2 = img2_ref[0]                  # (C, HW)
    hw = img1.shape[1]

    m1 = m1_ref[0]                      # (1, N)
    idx2 = idx2_ref[0]                  # (1, N + M*N)
    n = m1.shape[1]
    mn = idx2.shape[1] - n
    m_rep = mn // n

    # Single iota, hoisted and reused for both one-hot builds.
    row_ids = lax.broadcasted_iota(jnp.int32, (hw, 1), 0)

    # Fused one-hot gathers on the MXU: one matmul per source image
    # (image-2's match and non-match gathers share one one-hot / one matmul).
    oh1 = (row_ids == m1).astype(jnp.float32)                       # (HW, N)
    oh2 = (row_ids == idx2).astype(jnp.float32)                     # (HW, N+M*N)
    f1 = jnp.dot(img1, oh1, preferred_element_type=jnp.float32)     # (C, N)
    g2 = jnp.dot(img2, oh2, preferred_element_type=jnp.float32)     # (C, N+M*N)
    f2 = g2[:, :n]                                                  # (C, N)

    # ---- positive term: sum of squared L2 distances (mean taken in wrapper) ----
    d_pos = f1 - f2
    pos_sq_sum = jnp.sum(d_pos * d_pos)

    # ---- negative term: hard-negative hinge ----
    # No jnp.tile: broadcast f1 against each group of N non-match columns.
    # M is small, so this loop fully unrolls (static lane slices only).
    # Accumulate per-column vectors; do the cross-lane reduction once at the end.
    relu_acc = jnp.zeros((1, n), jnp.float32)
    hard_acc = jnp.zeros((1, n), jnp.float32)
    for m in range(m_rep):
        fn_m = g2[:, n + m * n: n + (m + 1) * n]                    # (C, N)
        d_neg = f1 - fn_m
        neg_sq = jnp.sum(d_neg * d_neg, axis=0, keepdims=True)      # (1, N)
        diff = margin - neg_sq
        relu_acc = relu_acc + jnp.maximum(diff, 0.0)
        hard_acc = hard_acc + (diff > 0.0).astype(jnp.float32)

    out_ref[0, 0, 0] = pos_sq_sum
    out_ref[0, 0, 1] = jnp.sum(relu_acc)
    out_ref[0, 0, 2] = jnp.sum(hard_acc)


def contrastive_loss_pallas(out_1, out_2, match_1, match_2, nonmatch_2,
                            margin=0.5, neg_loss_weight=1.0):
    """out_1/out_2: (B, C, W, H) float; match_*: (B, N, 2) int; nonmatch_2: (B, M, N, 2) int."""
    B, C, W, H = out_1.shape
    HW = W * H
    N = match_1.shape[1]
    M = nonmatch_2.shape[1]
    MN = M * N

    img1 = out_1.reshape(B, C, HW).astype(jnp.float32)
    img2 = out_2.reshape(B, C, HW).astype(jnp.float32)

    # flat spatial indices (row-major over (W, H)); image-2 indices fused into one array
    m1 = (match_1[..., 0] * H + match_1[..., 1]).astype(jnp.int32).reshape(B, 1, N)
    m2 = (match_2[..., 0] * H + match_2[..., 1]).astype(jnp.int32).reshape(B, 1, N)
    nm = (nonmatch_2[..., 0] * H + nonmatch_2[..., 1]).astype(jnp.int32).reshape(B, 1, MN)
    idx2 = jnp.concatenate([m2, nm], axis=-1)                       # (B, 1, N+MN)

    kernel = functools.partial(_contrastive_kernel, margin=float(margin))

    # explicit scoped-VMEM budget: 2 inputs x 2 pipeline buffers x C*HW*4 bytes
    # plus lane-padded one-hot intermediates; capped at v7x's 64 MiB physical VMEM.
    vmem_bytes = 2 * 2 * C * HW * 4 + 4 * HW * 128 * 4 + (2 << 20)
    vmem_limit = int(min(max(2 * vmem_bytes, 16 << 20), 64 << 20))

    partials = pl.pallas_call(
        kernel,
        out_shape=jax.ShapeDtypeStruct((B, 1, 3), jnp.float32),
        grid_spec=pltpu.PrefetchScalarGridSpec(
            num_scalar_prefetch=0,
            grid=(B,),
            in_specs=[
                pl.BlockSpec((1, C, HW), lambda b: (b, 0, 0)),
                pl.BlockSpec((1, C, HW), lambda b: (b, 0, 0)),
                pl.BlockSpec((1, 1, N), lambda b: (b, 0, 0)),
                pl.BlockSpec((1, 1, N + MN), lambda b: (b, 0, 0)),
            ],
            out_specs=pl.BlockSpec((1, 1, 3), lambda b: (b, 0, 0),
                                   memory_space=pltpu.SMEM),
        ),
        compiler_params=pltpu.CompilerParams(
            dimension_semantics=("parallel",),
            vmem_limit_bytes=vmem_limit),
    )(img1, img2, m1, idx2)

    partials = partials.reshape(B, 3)
    pos_loss = jnp.sum(partials[:, 0]) / float(B * N)
    relu_sum = jnp.sum(partials[:, 1])
    n_hard = jnp.sum(partials[:, 2])
    # identical to PyTorch when n_hard > 0; avoids NaN in the degenerate
    # zero-hard-negative case.
    neg_loss = jnp.where(n_hard > 0.0, relu_sum / jnp.maximum(n_hard, 1.0), 0.0)
    return pos_loss + neg_loss_weight * neg_loss


def contrastive_loss_ref(out_1, out_2, match_1, match_2, nonmatch_2,
                         margin=0.5, neg_loss_weight=1.0):
    """Pure-JAX reference mirroring the PyTorch module."""
    def feats(img, pos):                       # img (b,c,w,h), pos (b,n,2) -> (b,n,c)
        b = img.shape[0]
        return img[jnp.arange(b)[:, None], :, pos[:, :, 0], pos[:, :, 1]]

    f1 = feats(out_1, match_1)
    f2 = feats(out_2, match_2)
    pos_loss = jnp.mean(jnp.sum((f1 - f2) ** 2, -1))

    b, m, n, _ = nonmatch_2.shape
    fnm = feats(out_2, nonmatch_2.reshape(b, -1, 2))
    f1r = jnp.tile(f1, (1, m, 1))
    neg_d = jnp.sum((f1r - fnm) ** 2, -1)
    diff = margin - neg_d
    n_hard = jnp.sum((diff > 0.0).astype(jnp.float32))
    neg_loss = jnp.sum(jnp.maximum(diff, 0.0)) / n_hard
    return pos_loss + neg_loss_weight * neg_loss


if __name__ == "__main__":
    B, C, W, H = 2, 4, 16, 16
    N, M = 8, 3

    key = jax.random.PRNGKey(0)
    k1, k2, k3, k4, k5, k6, k7, k8 = jax.random.split(key, 8)

    # small-magnitude features so squared distances fall under the margin
    out_1 = 0.1 * jax.random.normal(k1, (B, C, W, H), jnp.float32)
    out_2 = 0.1 * jax.random.normal(k2, (B, C, W, H), jnp.float32)

    match_1 = jnp.concatenate(
        [jax.random.randint(k3, (B, N, 1), 0, W),
         jax.random.randint(k4, (B, N, 1), 0, H)], axis=-1)
    match_2 = jnp.concatenate(
        [jax.random.randint(k5, (B, N, 1), 0, W),
         jax.random.randint(k6, (B, N, 1), 0, H)], axis=-1)
    nonmatch_2 = jnp.concatenate(
        [jax.random.randint(k7, (B, M, N, 1), 0, W),
         jax.random.randint(k8, (B, M, N, 1), 0, H)], axis=-1)

    loss = contrastive_loss_pallas(out_1, out_2, match_1, match_2, nonmatch_2)
    loss = jax.block_until_ready(loss)

    ref = contrastive_loss_ref(out_1, out_2, match_1, match_2, nonmatch_2)
    ref = jax.block_until_ready(ref)

    assert jnp.allclose(loss, ref, rtol=1e-4, atol=1e-5), (loss, ref)
    print("KERNEL_OK")
</pallas_src>

<mosaic_0001>
module attributes {stable_mosaic.version = 11 : i64} {
  func.func @_contrastive_kernel(%arg0: i32, %arg1: memref<1x4x256xf32, #tpu.memory_space<vmem>>, %arg2: memref<1x4x256xf32, #tpu.memory_space<vmem>>, %arg3: memref<1x1x8xi32, #tpu.memory_space<vmem>>, %arg4: memref<1x1x32xi32, #tpu.memory_space<vmem>>, %arg5: memref<1x1x3xf32, #tpu.memory_space<smem>>) attributes {dimension_semantics = [#tpu.dimension_semantics<parallel>], iteration_bounds = array<i64: 2>, scalar_prefetch = 0 : i64, scratch_operands = 0 : i64, tpu.core_type = #tpu.core_type<tc>, window_params = [{transform_indices = @transform_0, window_bounds = array<i64: 1, 4, 256>}, {transform_indices = @transform_1, window_bounds = array<i64: 1, 4, 256>}, {transform_indices = @transform_2, window_bounds = array<i64: 1, 1, 8>}, {transform_indices = @transform_3, window_bounds = array<i64: 1, 1, 32>}, {transform_indices = @transform_4, window_bounds = array<i64: 1, 1, 3>}]} {
    %c0 = arith.constant 0 : index
    %c0_0 = arith.constant 0 : index
    %c0_1 = arith.constant 0 : index
    %0 = vector.load %arg1[%c0, %c0_0, %c0_1] : memref<1x4x256xf32, #tpu.memory_space<vmem>>, vector<1x4x256xf32>
    %1 = vector.shape_cast %0 : vector<1x4x256xf32> to vector<4x256xf32>
    %c0_2 = arith.constant 0 : index
    %c0_3 = arith.constant 0 : index
    %c0_4 = arith.constant 0 : index
    %2 = vector.load %arg2[%c0_2, %c0_3, %c0_4] : memref<1x4x256xf32, #tpu.memory_space<vmem>>, vector<1x4x256xf32>
    %3 = vector.shape_cast %2 : vector<1x4x256xf32> to vector<4x256xf32>
    %c0_5 = arith.constant 0 : index
    %c0_6 = arith.constant 0 : index
    %c0_7 = arith.constant 0 : index
    %4 = vector.load %arg3[%c0_5, %c0_6, %c0_7] : memref<1x1x8xi32, #tpu.memory_space<vmem>>, vector<1x1x8xi32>
    %5 = vector.shape_cast %4 : vector<1x1x8xi32> to vector<1x8xi32>
    %c0_8 = arith.constant 0 : index
    %c0_9 = arith.constant 0 : index
    %c0_10 = arith.constant 0 : index
    %6 = vector.load %arg4[%c0_8, %c0_9, %c0_10] : memref<1x1x32xi32, #tpu.memory_space<vmem>>, vector<1x1x32xi32>
    %7 = vector.shape_cast %6 : vector<1x1x32xi32> to vector<1x32xi32>
    %8 = tpu.iota {dimensions = array<i32: 0>} : vector<256x1xi32>
    %9 = vector.broadcast %8 : vector<256x1xi32> to vector<256x8xi32>
    %10 = vector.broadcast %5 : vector<1x8xi32> to vector<256x8xi32>
    %11 = arith.cmpi eq, %9, %10 : vector<256x8xi32>
    %12 = arith.extui %11 : vector<256x8xi1> to vector<256x8xi32>
    %13 = arith.sitofp %12 : vector<256x8xi32> to vector<256x8xf32>
    %14 = vector.broadcast %8 : vector<256x1xi32> to vector<256x32xi32>
    %15 = vector.broadcast %7 : vector<1x32xi32> to vector<256x32xi32>
    %16 = arith.cmpi eq, %14, %15 : vector<256x32xi32>
    %17 = arith.extui %16 : vector<256x32xi1> to vector<256x32xi32>
    %18 = arith.sitofp %17 : vector<256x32xi32> to vector<256x32xf32>
    %cst = arith.constant dense<0.000000e+00> : vector<4x8xf32>
    %19 = tpu.matmul %1, %13, %cst {dimension_numbers = #tpu.dot_dimension_numbers<[1], [0], [0], [1], [0, 0, 1, 1], [], []>} : vector<4x256xf32>, vector<256x8xf32>, vector<4x8xf32> -> vector<4x8xf32>
    %cst_11 = arith.constant dense<0.000000e+00> : vector<4x32xf32>
    %20 = tpu.matmul %3, %18, %cst_11 {dimension_numbers = #tpu.dot_dimension_numbers<[1], [0], [0], [1], [0, 0, 1, 1], [], []>} : vector<4x256xf32>, vector<256x32xf32>, vector<4x32xf32> -> vector<4x32xf32>
    %21 = vector.extract_strided_slice %20 {offsets = [0, 0], sizes = [4, 8], strides = [1, 1]} : vector<4x32xf32> to vector<4x8xf32>
    %22 = arith.subf %19, %21 : vector<4x8xf32>
    %23 = arith.mulf %22, %22 : vector<4x8xf32>
    %24 = vector.shape_cast %23 : vector<4x8xf32> to vector<1x4x8xf32>
    %cst_12 = arith.constant dense<0.000000e+00> : vector<1xf32>
    %25 = vector.multi_reduction <add>, %24, %cst_12 [1, 2] : vector<1x4x8xf32> to vector<1xf32>
    %26 = vector.shape_cast %25 : vector<1xf32> to vector<1x1x1xf32>
    %27 = vector.extract %26[0, 0, 0] : f32 from vector<1x1x1xf32>
    %cst_13 = arith.constant 0.000000e+00 : f32
    %28 = vector.broadcast %cst_13 : f32 to vector<1x8xf32>
    %cst_14 = arith.constant 0.000000e+00 : f32
    %29 = vector.broadcast %cst_14 : f32 to vector<1x8xf32>
    %30 = vector.extract_strided_slice %20 {offsets = [0, 8], sizes = [4, 8], strides = [1, 1]} : vector<4x32xf32> to vector<4x8xf32>
    %31 = arith.subf %19, %30 : vector<4x8xf32>
    %32 = arith.mulf %31, %31 : vector<4x8xf32>
    %cst_15 = arith.constant dense<0.000000e+00> : vector<8xf32>
    %33 = vector.multi_reduction <add>, %32, %cst_15 [0] : vector<4x8xf32> to vector<8xf32>
    %34 = vector.shape_cast %33 : vector<8xf32> to vector<1x8xf32>
    %cst_16 = arith.constant 5.000000e-01 : f32
    %35 = vector.broadcast %cst_16 : f32 to vector<1x8xf32>
    %36 = arith.subf %35, %34 : vector<1x8xf32>
    %cst_17 = arith.constant 0.000000e+00 : f32
    %37 = vector.broadcast %cst_17 : f32 to vector<1x8xf32>
    %38 = arith.maximumf %36, %37 : vector<1x8xf32>
    %39 = arith.addf %28, %38 : vector<1x8xf32>
    %cst_18 = arith.constant 0.000000e+00 : f32
    %40 = vector.broadcast %cst_18 : f32 to vector<1x8xf32>
    %41 = arith.cmpf ogt, %36, %40 : vector<1x8xf32>
    %42 = arith.extui %41 : vector<1x8xi1> to vector<1x8xi32>
    %43 = arith.sitofp %42 : vector<1x8xi32> to vector<1x8xf32>
    %44 = arith.addf %29, %43 : vector<1x8xf32>
    %45 = vector.extract_strided_slice %20 {offsets = [0, 16], sizes = [4, 8], strides = [1, 1]} : vector<4x32xf32> to vector<4x8xf32>
    %46 = arith.subf %19, %45 : vector<4x8xf32>
    %47 = arith.mulf %46, %46 : vector<4x8xf32>
    %cst_19 = arith.constant dense<0.000000e+00> : vector<8xf32>
    %48 = vector.multi_reduction <add>, %47, %cst_19 [0] : vector<4x8xf32> to vector<8xf32>
    %49 = vector.shape_cast %48 : vector<8xf32> to vector<1x8xf32>
    %cst_20 = arith.constant 5.000000e-01 : f32
    %50 = vector.broadcast %cst_20 : f32 to vector<1x8xf32>
    %51 = arith.subf %50, %49 : vector<1x8xf32>
    %cst_21 = arith.constant 0.000000e+00 : f32
    %52 = vector.broadcast %cst_21 : f32 to vector<1x8xf32>
    %53 = arith.maximumf %51, %52 : vector<1x8xf32>
    %54 = arith.addf %39, %53 : vector<1x8xf32>
    %cst_22 = arith.constant 0.000000e+00 : f32
    %55 = vector.broadcast %cst_22 : f32 to vector<1x8xf32>
    %56 = arith.cmpf ogt, %51, %55 : vector<1x8xf32>
    %57 = arith.extui %56 : vector<1x8xi1> to vector<1x8xi32>
    %58 = arith.sitofp %57 : vector<1x8xi32> to vector<1x8xf32>
    %59 = arith.addf %44, %58 : vector<1x8xf32>
    %60 = vector.extract_strided_slice %20 {offsets = [0, 24], sizes = [4, 8], strides = [1, 1]} : vector<4x32xf32> to vector<4x8xf32>
    %61 = arith.subf %19, %60 : vector<4x8xf32>
    %62 = arith.mulf %61, %61 : vector<4x8xf32>
    %cst_23 = arith.constant dense<0.000000e+00> : vector<8xf32>
    %63 = vector.multi_reduction <add>, %62, %cst_23 [0] : vector<4x8xf32> to vector<8xf32>
    %64 = vector.shape_cast %63 : vector<8xf32> to vector<1x8xf32>
    %cst_24 = arith.constant 5.000000e-01 : f32
    %65 = vector.broadcast %cst_24 : f32 to vector<1x8xf32>
    %66 = arith.subf %65, %64 : vector<1x8xf32>
    %cst_25 = arith.constant 0.000000e+00 : f32
    %67 = vector.broadcast %cst_25 : f32 to vector<1x8xf32>
    %68 = arith.maximumf %66, %67 : vector<1x8xf32>
    %69 = arith.addf %54, %68 : vector<1x8xf32>
    %cst_26 = arith.constant 0.000000e+00 : f32
    %70 = vector.broadcast %cst_26 : f32 to vector<1x8xf32>
    %71 = arith.cmpf ogt, %66, %70 : vector<1x8xf32>
    %72 = arith.extui %71 : vector<1x8xi1> to vector<1x8xi32>
    %73 = arith.sitofp %72 : vector<1x8xi32> to vector<1x8xf32>
    %74 = arith.addf %59, %73 : vector<1x8xf32>
    %c0_27 = arith.constant 0 : index
    %c0_28 = arith.constant 0 : index
    %c0_29 = arith.constant 0 : index
    %75 = memref.load %arg5[%c0_27, %c0_28, %c0_29] : memref<1x1x3xf32, #tpu.memory_space<smem>>
    memref.store %27, %arg5[%c0_27, %c0_28, %c0_29] : memref<1x1x3xf32, #tpu.memory_space<smem>>
    %76 = vector.shape_cast %69 : vector<1x8xf32> to vector<1x1x8xf32>
    %cst_30 = arith.constant dense<0.000000e+00> : vector<1xf32>
    %77 = vector.multi_reduction <add>, %76, %cst_30 [1, 2] : vector<1x1x8xf32> to vector<1xf32>
    %78 = vector.shape_cast %77 : vector<1xf32> to vector<1x1x1xf32>
    %79 = vector.extract %78[0, 0, 0] : f32 from vector<1x1x1xf32>
    %c0_31 = arith.constant 0 : index
    %c0_32 = arith.constant 0 : index
    %c1 = arith.constant 1 : index
    %80 = memref.load %arg5[%c0_31, %c0_32, %c1] : memref<1x1x3xf32, #tpu.memory_space<smem>>
    memref.store %79, %arg5[%c0_31, %c0_32, %c1] : memref<1x1x3xf32, #tpu.memory_space<smem>>
    %81 = vector.shape_cast %74 : vector<1x8xf32> to vector<1x1x8xf32>
    %cst_33 = arith.constant dense<0.000000e+00> : vector<1xf32>
    %82 = vector.multi_reduction <add>, %81, %cst_33 [1, 2] : vector<1x1x8xf32> to vector<1xf32>
    %83 = vector.shape_cast %82 : vector<1xf32> to vector<1x1x1xf32>
    %84 = vector.extract %83[0, 0, 0] : f32 from vector<1x1x1xf32>
    %c0_34 = arith.constant 0 : index
    %c0_35 = arith.constant 0 : index
    %c2 = arith.constant 2 : index
    %85 = memref.load %arg5[%c0_34, %c0_35, %c2] : memref<1x1x3xf32, #tpu.memory_space<smem>>
    memref.store %84, %arg5[%c0_34, %c0_35, %c2] : memref<1x1x3xf32, #tpu.memory_space<smem>>
    return
  }
  func.func @transform_0(%arg0: i32) -> (i32, i32, i32) {
    %c0_i32 = arith.constant 0 : i32
    %c0_i32_0 = arith.constant 0 : i32
    %c0_i32_1 = arith.constant 0 : i32
    return %arg0, %c0_i32, %c0_i32_0 : i32, i32, i32
  }
  func.func @transform_1(%arg0: i32) -> (i32, i32, i32) {
    %c0_i32 = arith.constant 0 : i32
    %c0_i32_0 = arith.constant 0 : i32
    %c0_i32_1 = arith.constant 0 : i32
    return %arg0, %c0_i32, %c0_i32_0 : i32, i32, i32
  }
  func.func @transform_2(%arg0: i32) -> (i32, i32, i32) {
    %c0_i32 = arith.constant 0 : i32
    %c0_i32_0 = arith.constant 0 : i32
    %c0_i32_1 = arith.constant 0 : i32
    return %arg0, %c0_i32, %c0_i32_0 : i32, i32, i32
  }
  func.func @transform_3(%arg0: i32) -> (i32, i32, i32) {
    %c0_i32 = arith.constant 0 : i32
    %c0_i32_0 = arith.constant 0 : i32
    %c0_i32_1 = arith.constant 0 : i32
    return %arg0, %c0_i32, %c0_i32_0 : i32, i32, i32
  }
  func.func @transform_4(%arg0: i32) -> (i32, i32, i32) {
    %c0_i32 = arith.constant 0 : i32
    %c0_i32_0 = arith.constant 0 : i32
    %c0_i32_1 = arith.constant 0 : i32
    return %arg0, %c0_i32, %c0_i32_0 : i32, i32, i32
  }
}

</mosaic_0001>

<bundles_post_ra>
// kernel: tpu_custom_call.1
= control target key start
LH: loop header
LB: loop body
LE: loop exit
PB: predicated region body
PF: predicated region fallthrough
CT: control target
= control target key end

     0   :  { %s1664_s0 = inlined_call_operand.hbm [shape: f32[2,4,256], index: 0, kind: input, shape index: {}]   ;;  %s1665_s1 = inlined_call_operand.hbm [shape: f32[2,4,256], index: 1, kind: input, shape index: {}]   ;;  %s1666_s2 = inlined_call_operand.hbm [shape: s32[2,1,8], index: 2, kind: input, shape index: {}]   ;;  %s1667_s3 = inlined_call_operand.vmem [shape: s32[2,1,32], index: 3, kind: input, shape index: {}]   ;;  %s1668_s4 = inlined_call_operand.hbm [shape: f32[2,1,3], index: 4, kind: output, shape index: {}]  }
   0x1   :  { %1669 = sst [smem:[#allocation13_spill]] %s1665_s1 }
   0x2   :  { %9 = vsyncpa [#allocation3], 0 }
   0x3   :  { %11 = vsyncpa [#allocation3 + $0x1], 0 }
   0x4   :  { %12 = vsyncpa [#allocation6], 0 }
   0x5   :  { %14 = vsyncpa [#allocation6 + $0x1], 0 }
   0x6   :  { %15 = vsyncpa [#allocation4], 0 }
   0x7   :  { %17 = vsyncpa [#allocation4 + $0x1], 0  ;;  %s1245_s15 = smov 0   ;;  %s1247_s16 = smov 0  }
   0x8   :  { %s1249_s17 = smov 0   ;;  %s1251_s18 = smov 0  }
   0x9 LB: > { %s1266_s19 = sadd.s32 4294967295, %s1213_s18   ;;  %s854_s20 = sadd.s32 4294967294, %s1213_s18   ;;  %s1213_s18 = sphi %s1251_s18, %s1681_s18   ;;  %s1209_s17 = sphi %s1249_s17, %s1680_s17   ;;  %s1205_s16 = sphi %s1247_s16, %s1679_s16   ;;  %s1201_s15 = sphi %s1245_s15, %s1678_s15  }
   0xa   : > { %s1270_s21 = sadd.s32 1, %s1213_s18   ;;  %s30_s22 = sadd.s32 1, %s1209_s17 }
   0xb   : > { %s27_s23 = ssub.s32 %s1213_s18, %s1270_s21  ;;  %p37_p0 = scmp.ne.s32.totalorder %s1209_s17, %s1205_s16 }
   0xc   : > { %p28_p1 = scmp.eq.s32.totalorder %s27_s23, 0  ;;  %p38_p2 = scmp.eq.s32.totalorder %s1213_s18, 0 }
   0xd   : > { %p43_p3 = scmp.ne.s32.totalorder %s1205_s16, %s1201_s15  ;;  %p44_p4 = scmp.eq.s32.totalorder %s1266_s19, 0 }
   0xe   : > { %s1282_s24 = scalar_select %p28_p1, %s1209_s17, %s30_s22  }
   0xf   : > { %p39_p5 = por %p38_p2, %p37_p0  ;;  %p1284_p6 = por %p44_p4, %p43_p3 }
  0x10   : > { %1670 = sst [smem:[#allocation12_spill]] %s1282_s24  ;;  %p145_p7 = scmp.eq.s32.totalorder %s1266_s19, 1 }
  0x11   : > { %p151_p8 = scmp.eq.s32.totalorder %s854_s20, 1  ;;  %p1027_p9 = scmp.lt.s32.totalorder %s1213_s18, 2 }
  0x12   : > { %p1290_p10 = por %p145_p7, %p37_p0  ;;  %s1299_s28 = sand.u32 1, %s1209_s17  }
  0x13   : > { %p1294_p11 = por %p151_p8, %p43_p3  ;;  %s1001_s29 = sshll.u32 %s1213_s18, 3 }
  0x14   : > { %s857_s30 = sshll.u32 %s1299_s28, 3  ;;  %p1305_p12 = pnand %p1027_p9, %p39_p5 }
  0x15   : > { %s191_s6 = sand.u32 1, %s1213_s18   ;;  %s1675_s1 = sld [smem:[#allocation13_spill]] }
  0x16   : > { %s195_s10 = scalar_lea.vmem [#allocation5], %s857_s30  ;;  %p863_p13 = scmp.ge.s32.totalorder %s1213_s18, 1 }
  0x17   : > { %s204_s11 = sshll.u32 %s195_s10, 4  ;;  %s1316_s13 = scalar_lea.sflag [#allocation6], %s191_s6  ;;  %s205_s11 = int_to_ptr.vmem [resolvable:$true] %s204_s11 }
  0x18   : > { %p1071_p1 = pneg %p1305_p12 }
  0x1b   : > { %s200_s9 = scalar_lea.hbm %s1675_s1, %s1001_s29  ;;  %s1074_s7 = scalar_lea.hbm %s1675_s1, 16 }
  0x1c   : > { %s202_s12 = sshll.u32 %s200_s9, 4  ;;  %s203_s12 = int_to_ptr.hbm [resolvable:$true] %s202_s12 }
  0x1d   : > { %s1067_s14 = sshra.s32 %s203_s12, 4  ;;  %s1068_s14 = int_to_ptr.hbm [resolvable:$true] %s1067_s14 }
  0x1e   : > { %s1069_s20 = scalar_lea.hbm %s1068_s14, 8  ;;  %p1075_p4 = scmp.lt.s32.totalorder %s1068_s14, %s1675_s1 }
  0x1f   : > { %p1070_p0 = scmp.ne.s32.totalorder %s1068_s14, %s1069_s20  ;;  %p1076_p5 = scmp.lt.s32.totalorder %s1074_s7, %s1069_s20 }
  0x21   : > { %p1072_p2 = pnand %p1071_p1, %p1070_p0  ;;  %p1077_p7 = por %p1076_p5, %p1075_p4 }
  0x23   : > { %p1073_p3 = pneg %p1072_p2 }
  0x25   : > { %p1078_p8 = pnand %p1077_p7, %p1073_p3 }
  0x27   : > { %1081 = shalt.err (!%p1078_p8)
}
  0x28   : > { %1023 = dma.hbm_to_vmem [thread:$0]  (!%p1305_p12), %s203_s12, 128, %s205_s11, %s1316_s13  }
  0x29   : > { %p232_p0 = scmp.lt.s32.totalorder %s1213_s18, 3  ;;  %s180_s22 = scalar_lea.hbm %s1664_s0, %s1001_s29 }
  0x2a   : > { %s182_s20 = sshll.u32 %s180_s22, 4  ;;  %s175_s23 = scalar_lea.vmem [#allocation2], %s857_s30  ;;  %s183_s20 = int_to_ptr.hbm [resolvable:$true] %s182_s20 }
  0x2b   : > { %p1338_p2 = pnand %p863_p13, %p232_p0  ;;  %s184_s7 = sshll.u32 %s175_s23, 4  ;;  %s185_s7 = int_to_ptr.vmem [resolvable:$true] %s184_s7 }
  0x2c   : > { %s172_s8 = scalar_lea.sflag [#allocation3], %s1299_s28  ;;  %s1097_s9 = sshra.s32 %s183_s20, 4  ;;  %s1098_s9 = int_to_ptr.hbm [resolvable:$true] %s1097_s9 }
  0x2d   : > { %s1099_s11 = scalar_lea.hbm %s1098_s9, 8  ;;  %s1104_s6 = scalar_lea.hbm %s1664_s0, 16 }
  0x2e   : > { %p1100_p3 = scmp.ne.s32.totalorder %s1098_s9, %s1099_s11  ;;  %p1105_p13 = scmp.lt.s32.totalorder %s1098_s9, %s1664_s0 }
  0x2f   : > { %p1106_p7 = scmp.lt.s32.totalorder %s1104_s6, %s1099_s11 }
  0x30   : > { %p1102_p4 = pnand %p1100_p3, %p1071_p1 }
  0x31   : > { %p1107_p8 = por %p1106_p7, %p1105_p13 }
  0x32   : > { %p1103_p5 = pneg %p1102_p4 }
  0x34   : > { %p1108_p0 = pnand %p1107_p8, %p1103_p5 }
  0x36   : > { %1111 = shalt.err (!%p1108_p0)
}
  0x37   : > { %1020 = dma.hbm_to_vmem [thread:$0]  (!%p1305_p12), %s183_s20, 128, %s185_s7, %s172_s8  }
  0x38   : > { %s217_s1 = scalar_lea.hbm %s1666_s2, %s1213_s18  ;;  %s214_s29 = scalar_lea.vmem [#allocation7], %s1299_s28 }
  0x39   : > { %s221_s12 = sshll.u32 %s214_s29, 4  ;;  %s219_s24 = sshll.u32 %s217_s1, 4  ;;  %s222_s12 = int_to_ptr.vmem [resolvable:$true] %s221_s12  ;;  %s220_s24 = int_to_ptr.hbm [resolvable:$true] %s219_s24 }
  0x3a   : > { %s1127_s9 = sshra.s32 %s220_s24, 4  ;;  %s1134_s20 = scalar_lea.hbm %s1666_s2, 2  ;;  %s1128_s9 = int_to_ptr.hbm [resolvable:$true] %s1127_s9 }
  0x3b   : > { %s1129_s11 = scalar_lea.hbm %s1128_s9, 1  ;;  %p1135_p13 = scmp.lt.s32.totalorder %s1128_s9, %s1666_s2 }
  0x3c   : > { %p1130_p3 = scmp.ne.s32.totalorder %s1128_s9, %s1129_s11  ;;  %p1136_p7 = scmp.lt.s32.totalorder %s1134_s20, %s1129_s11 }
  0x3e   : > { %p1132_p4 = pnand %p1130_p3, %p1071_p1  ;;  %p1137_p8 = por %p1136_p7, %p1135_p13 }
  0x40   : > { %p1133_p5 = pneg %p1132_p4 }
  0x42   : > { %p1138_p0 = pnand %p1137_p8, %p1133_p5 }
  0x44   : > { %1141 = shalt.err (!%p1138_p0)
}
  0x45   : > { %1026 = dma.hbm_to_vmem [thread:$0]  (!%p1305_p12), %s220_s24, 16, %s222_s12, %s1316_s13  }
  0x46   : > { %236 = sbr.rel (%p1338_p2) target bundleno = 590 (0x24e), region = 36  ;;  %s1376_s1 = sand.u32 (!%p1338_p2), 1, %s1205_s16  }
  0x47   : > { %s864_s28 = sshll.u32 (!%p1338_p2), %s1376_s1, 3  ;;  %s239_s22 = scalar_lea.sflag (!%p1338_p2), [#allocation3], %s1376_s1 }
  0x48   : > { %s1380_s30 = scalar_lea.vmem (!%p1338_p2), [#allocation2], %s864_s28 }
  0x4b   : > { %1188 = dma.done.wait (%p1284_p6), %s239_s22, 128  }
  0x4c   : > { %1190 = vsyncadd (%p1284_p6), %s239_s22, 4294967168  ;;  %s248_s24 = sand.u32 1, %s1266_s19   ;;  %s1387_s13 = scalar_lea.vmem [#allocation5], %s864_s28 }
  0x4d   : > { %s249_s5 = scalar_lea.sflag [#allocation6], %s248_s24 }
  0x4e   : > { %1192 = dma.done.wait (%p1284_p6), %s249_s5, 144  }
  0x4f   : > { %1194 = vsyncadd (%p1284_p6), %s249_s5, 4294967152  ;;  %p299_p12 = scmp.lt.s32.totalorder %s1266_s19, 1  ;;  %v306_v0 = vlaneseq  ;;  %s261_s25 = scalar_lea.vmem [#allocation7], %s1376_s1  ;;  %v1215_v12 = vmov 1.0   ;;  %v302_v25 = vld [vmem:[%s1380_s30] sm:$0xff]  ;;  %v303_v34 = vld [vmem:[%s1387_s13] sm:$0xff] }
  0x50   : > { %v1405_v6 = vld [vmem:[%s261_s25] ss:$0 sm:$0xff]  ;;  %534 = vst [vmem:[#allocation1] ss:$2 sm:$0xff] %v302_v25  ;;  %s1216_s9 = smov 104   ;;  %s1217_s11 = smov 120  }
  0x51   : > { %s300_s14 = scalar_select %p299_p12, %s1266_s19, 1  ;;  %v1395_v1 = vshrl.u32 %v306_v0, 7 }
  0x52   : > { %s1218_s6 = smov 112   ;;  %s866_s10 = sshll.u32 %s1376_s1, 7 }
  0x53   : > { %s301_s12 = scalar_lea.vmem %s1667_s3, %s300_s14  ;;  %v322_v2 = vadd.s32 120, %v1395_v1  ;;  %v338_v3 = vadd.s32 248, %v1395_v1  ;;  %v321_v4 = vadd.s32 112, %v1395_v1  ;;  %v337_v5 = vadd.s32 240, %v1395_v1  ;;  %s1623_s7 = scalar_lea.smem [#allocation8], %s866_s10 }
  0x54   : > { %v1407_v7 = vld [vmem:[%s301_s12] ss:$0 sm:$0xff]  ;;  %v320_v8 = vadd.s32 104, %v1395_v1  ;;  %v336_v9 = vadd.s32 232, %v1395_v1  ;;  %v319_v10 = vadd.s32 96, %v1395_v1  ;;  %v335_v11 = vadd.s32 224, %v1395_v1  ;;  %s733_s24 = scalar_lea.hbm %s1668_s4, %s1266_s19 }
  0x55   : > { %vm355_vm0 = vcmp.eq.s32.totalorder %v322_v2, %v1405_v6  ;;  %vm371_vm1 = vcmp.eq.s32.totalorder %v338_v3, %v1405_v6  ;;  %vm354_vm2 = vcmp.eq.s32.totalorder %v321_v4, %v1405_v6  ;;  %vm452_vm3 = vcmp.eq.s32.totalorder %v322_v2, %v1407_v7  ;;  %s709_s8 = scalar_lea.smem %s1623_s7, 1 [#allocation8]  ;;  %s735_s5 = sshll.u32 %s733_s24, 4  ;;  %s736_s5 = int_to_ptr.hbm [resolvable:$true] %s735_s5 }
  0x56   : > { %vm468_vm4 = vcmp.eq.s32.totalorder %v338_v3, %v1407_v7  ;;  %vm451_vm5 = vcmp.eq.s32.totalorder %v321_v4, %v1407_v7  ;;  %vm467_vm6 = vcmp.eq.s32.totalorder %v337_v5, %v1407_v7  ;;  %931 = vmatpush.msk.msra.mxu0 %vm355_vm0, %v1215_v12  ;;  %963 = vmatpush.msk.msra.mxu2 %vm452_vm3, %v1215_v12  ;;  %v318_v13 = vadd.s32 88, %v1395_v1  ;;  %s721_s13 = scalar_lea.smem %s1623_s7, 2 [#allocation8]  ;;  %s724_s23 = scalar_lea.sflag [#allocation4], %s1376_s1 }
  0x57   : > { %979 = vmatpush.msk.msra.mxu3 %vm468_vm4, %v1215_v12  ;;  %vm370_vm7 = vcmp.eq.s32.totalorder %v337_v5, %v1405_v6  ;;  %vm450_vm8 = vcmp.eq.s32.totalorder %v320_v8, %v1407_v7  ;;  %vm466_vm9 = vcmp.eq.s32.totalorder %v336_v9, %v1407_v7  ;;  %947 = vmatpush.msk.msra.mxu1 %vm371_vm1, %v1215_v12  ;;  %v334_v14 = vadd.s32 216, %v1395_v1  ;;  %v535_v37 = vld.sshfl [vmem:[#allocation1] sm:$0xff pattern:$0x75316420]  ;;  %s1157_s29 = sshra.s32 %s736_s5, 4  ;;  %s1158_s29 = int_to_ptr.hbm [resolvable:$true] %s1157_s29 }
  0x58   : > { %932 = vmatpush.msk.msra.mxu0 %vm354_vm2, %v1215_v12  ;;  %964 = vmatpush.msk.msra.mxu2 %vm451_vm5, %v1215_v12  ;;  %vm353_vm10 = vcmp.eq.s32.totalorder %v320_v8, %v1405_v6  ;;  %vm369_vm11 = vcmp.eq.s32.totalorder %v336_v9, %v1405_v6  ;;  %v317_v15 = vadd.s32 80, %v1395_v1  ;;  %vm449_vm12 = vcmp.eq.s32.totalorder %v319_v10, %v1407_v7  ;;  %v536_v38 = vld.sshfl [vmem:[#allocation1 + $0x8] sm:$0xff pattern:$0x75316420]  ;;  %s1159_s12 = scalar_lea.hbm %s1158_s29, 1  ;;  %p1164_p3 = scmp.lt.s32.totalorder %s1158_s29, %s1668_s4 }
  0x59   : > { %980 = vmatpush.msk.msra.mxu3 %vm467_vm6, %v1215_v12  ;;  %vm465_vm13 = vcmp.eq.s32.totalorder %v335_v11, %v1407_v7  ;;  %948 = vmatpush.msk.msra.mxu1 %vm370_vm7, %v1215_v12  ;;  %v333_v16 = vadd.s32 208, %v1395_v1  ;;  %vm352_vm14 = vcmp.eq.s32.totalorder %v319_v10, %v1405_v6  ;;  %vm368_vm15 = vcmp.eq.s32.totalorder %v335_v11, %v1405_v6  ;;  %p1160_p6 = scmp.ne.s32.totalorder %s1158_s29, %s1159_s12 }
  0x5a   : > { %933 = vmatpush.msk.msra.mxu0 %vm353_vm10, %v1215_v12  ;;  %965 = vmatpush.msk.msra.mxu2 %vm450_vm8, %v1215_v12  ;;  %vm351_vm0 = vcmp.eq.s32.totalorder %v318_v13, %v1405_v6  ;;  %vm448_vm1 = vcmp.eq.s32.totalorder %v318_v13, %v1407_v7  ;;  %vm464_vm2 = vcmp.eq.s32.totalorder %v334_v14, %v1407_v7  ;;  %v316_v17 = vadd.s32 72, %v1395_v1 }
  0x5b   : > { %981 = vmatpush.msk.msra.mxu3 %vm466_vm9, %v1215_v12  ;;  %949 = vmatpush.msk.msra.mxu1 %vm369_vm11, %v1215_v12  ;;  %v332_v18 = vadd.s32 200, %v1395_v1  ;;  %vm367_vm3 = vcmp.eq.s32.totalorder %v334_v14, %v1405_v6  ;;  %vm350_vm4 = vcmp.eq.s32.totalorder %v317_v15, %v1405_v6  ;;  %vm447_vm5 = vcmp.eq.s32.totalorder %v317_v15, %v1407_v7  ;;  %p1161_p1 = pnand %p1160_p6, %p1290_p10 }
  0x5c   : > { %934 = vmatpush.msk.msra.mxu0 %vm352_vm14, %v1215_v12  ;;  %966 = vmatpush.msk.msra.mxu2 %vm449_vm12, %v1215_v12  ;;  %vm463_vm6 = vcmp.eq.s32.totalorder %v333_v16, %v1407_v7  ;;  %v315_v19 = vadd.s32 64, %v1395_v1  ;;  %v331_v20 = vadd.s32 192, %v1395_v1  ;;  %vm366_vm7 = vcmp.eq.s32.totalorder %v333_v16, %v1405_v6  ;;  %580 = vst [vmem:[#allocation1] ss:$2 sm:$0xff] %v303_v34 }
  0x5d   : > { %982 = vmatpush.msk.msra.mxu3 %vm465_vm13, %v1215_v12  ;;  %950 = vmatpush.msk.msra.mxu1 %vm368_vm15, %v1215_v12  ;;  %vm349_vm8 = vcmp.eq.s32.totalorder %v316_v17, %v1405_v6  ;;  %vm446_vm9 = vcmp.eq.s32.totalorder %v316_v17, %v1407_v7  ;;  %vm462_vm10 = vcmp.eq.s32.totalorder %v332_v18, %v1407_v7  ;;  %v314_v21 = vadd.s32 56, %v1395_v1  ;;  %p1162_p2 = pneg %p1161_p1 }
  0x5e   : > { %935 = vmatpush.msk.msra.mxu0 %vm351_vm0, %v1215_v12  ;;  %967 = vmatpush.msk.msra.mxu2 %vm448_vm1, %v1215_v12  ;;  %v330_v22 = vadd.s32 184, %v1395_v1  ;;  %vm365_vm11 = vcmp.eq.s32.totalorder %v332_v18, %v1405_v6  ;;  %vm348_vm12 = vcmp.eq.s32.totalorder %v315_v19, %v1405_v6  ;;  %vm445_vm13 = vcmp.eq.s32.totalorder %v315_v19, %v1407_v7 }
  0x5f   : > { %983 = vmatpush.msk.msra.mxu3 %vm464_vm2, %v1215_v12  ;;  %951 = vmatpush.msk.msra.mxu1 %vm367_vm3, %v1215_v12  ;;  %vm461_vm14 = vcmp.eq.s32.totalorder %v331_v20, %v1407_v7  ;;  %v313_v23 = vadd.s32 48, %v1395_v1  ;;  %v329_v24 = vadd.s32 176, %v1395_v1  ;;  %vm364_vm15 = vcmp.eq.s32.totalorder %v331_v20, %v1405_v6 }
  0x60   : > { %936 = vmatpush.msk.msra.mxu0 %vm350_vm4, %v1215_v12  ;;  %968 = vmatpush.msk.msra.mxu2 %vm447_vm5, %v1215_v12  ;;  %vm347_vm0 = vcmp.eq.s32.totalorder %v314_v21, %v1405_v6  ;;  %vm444_vm1 = vcmp.eq.s32.totalorder %v314_v21, %v1407_v7  ;;  %vm460_vm2 = vcmp.eq.s32.totalorder %v330_v22, %v1407_v7  ;;  %v312_v26 = vadd.s32 40, %v1395_v1 }
  0x61   : > { %984 = vmatpush.msk.msra.mxu3 %vm463_vm6, %v1215_v12  ;;  %952 = vmatpush.msk.msra.mxu1 %vm366_vm7, %v1215_v12  ;;  %v328_v27 = vadd.s32 168, %v1395_v1  ;;  %vm363_vm3 = vcmp.eq.s32.totalorder %v330_v22, %v1405_v6  ;;  %vm346_vm4 = vcmp.eq.s32.totalorder %v313_v23, %v1405_v6  ;;  %vm443_vm5 = vcmp.eq.s32.totalorder %v313_v23, %v1407_v7 }
  0x62   : > { %937 = vmatpush.msk.msra.mxu0 %vm349_vm8, %v1215_v12  ;;  %969 = vmatpush.msk.msra.mxu2 %vm446_vm9, %v1215_v12  ;;  %vm459_vm6 = vcmp.eq.s32.totalorder %v329_v24, %v1407_v7  ;;  %v311_v28 = vadd.s32 32, %v1395_v1  ;;  %v327_v29 = vadd.s32 160, %v1395_v1  ;;  %vm362_vm7 = vcmp.eq.s32.totalorder %v329_v24, %v1405_v6 }
  0x63   : > { %985 = vmatpush.msk.msra.mxu3 %vm462_vm10, %v1215_v12  ;;  %953 = vmatpush.msk.msra.mxu1 %vm365_vm11, %v1215_v12  ;;  %vm345_vm8 = vcmp.eq.s32.totalorder %v312_v26, %v1405_v6  ;;  %vm442_vm9 = vcmp.eq.s32.totalorder %v312_v26, %v1407_v7  ;;  %vm458_vm10 = vcmp.eq.s32.totalorder %v328_v27, %v1407_v7  ;;  %v310_v30 = vadd.s32 24, %v1395_v1  ;;  %v581_v40 = vld.sshfl [vmem:[#allocation1] sm:$0xff pattern:$0x75316420] }
  0x64   : > { %938 = vmatpush.msk.msra.mxu0 %vm348_vm12, %v1215_v12  ;;  %970 = vmatpush.msk.msra.mxu2 %vm445_vm13, %v1215_v12  ;;  %v326_v31 = vadd.s32 152, %v1395_v1  ;;  %vm361_vm11 = vcmp.eq.s32.totalorder %v328_v27, %v1405_v6  ;;  %vm344_vm12 = vcmp.eq.s32.totalorder %v311_v28, %v1405_v6  ;;  %vm441_vm13 = vcmp.eq.s32.totalorder %v311_v28, %v1407_v7  ;;  %v582_v41 = vld.sshfl [vmem:[#allocation1 + $0x8] sm:$0xff pattern:$0x75316420] }
  0x65   : > { %986 = vmatpush.msk.msra.mxu3 %vm461_vm14, %v1215_v12  ;;  %954 = vmatpush.msk.msra.mxu1 %vm364_vm15, %v1215_v12  ;;  %vm457_vm14 = vcmp.eq.s32.totalorder %v327_v29, %v1407_v7  ;;  %v309_v32 = vadd.s32 16, %v1395_v1  ;;  %v325_v33 = vadd.s32 144, %v1395_v1  ;;  %vm360_vm15 = vcmp.eq.s32.totalorder %v327_v29, %v1405_v6 }
  0x66   : > { %939 = vmatpush.msk.msra.mxu0 %vm347_vm0, %v1215_v12  ;;  %971 = vmatpush.msk.msra.mxu2 %vm444_vm1, %v1215_v12  ;;  %vm343_vm0 = vcmp.eq.s32.totalorder %v310_v30, %v1405_v6  ;;  %vm440_vm1 = vcmp.eq.s32.totalorder %v310_v30, %v1407_v7  ;;  %v308_v35 = vadd.s32 8, %v1395_v1  ;;  %v324_v36 = vadd.s32 136, %v1395_v1 }
  0x67   : > { %987 = vmatpush.msk.msra.mxu3 %vm460_vm2, %v1215_v12  ;;  %955 = vmatpush.msk.msra.mxu1 %vm363_vm3, %v1215_v12  ;;  %vm456_vm2 = vcmp.eq.s32.totalorder %v326_v31, %v1407_v7  ;;  %vm359_vm3 = vcmp.eq.s32.totalorder %v326_v31, %v1405_v6  ;;  %v323_v39 = vadd.s32 128, %v1395_v1  ;;  %v1219_v24 = vmov 0.0  }
  0x68   : > { %940 = vmatpush.msk.msra.mxu0 %vm346_vm4, %v1215_v12  ;;  %972 = vmatpush.msk.msra.mxu2 %vm443_vm5, %v1215_v12  ;;  %vm342_vm4 = vcmp.eq.s32.totalorder %v309_v32, %v1405_v6  ;;  %vm439_vm5 = vcmp.eq.s32.totalorder %v309_v32, %v1407_v7 }
  0x69   : > { %988 = vmatpush.msk.msra.mxu3 %vm459_vm6, %v1215_v12  ;;  %956 = vmatpush.msk.msra.mxu1 %vm362_vm7, %v1215_v12  ;;  %vm455_vm6 = vcmp.eq.s32.totalorder %v325_v33, %v1407_v7  ;;  %vm358_vm7 = vcmp.eq.s32.totalorder %v325_v33, %v1405_v6 }
  0x6a   : > { %941 = vmatpush.msk.msra.mxu0 %vm345_vm8, %v1215_v12  ;;  %973 = vmatpush.msk.msra.mxu2 %vm442_vm9, %v1215_v12  ;;  %vm341_vm8 = vcmp.eq.s32.totalorder %v308_v35, %v1405_v6  ;;  %vm438_vm9 = vcmp.eq.s32.totalorder %v308_v35, %v1407_v7 }
  0x6b   : > { %989 = vmatpush.msk.msra.mxu3 %vm458_vm10, %v1215_v12  ;;  %957 = vmatpush.msk.msra.mxu1 %vm361_vm11, %v1215_v12  ;;  %vm454_vm10 = vcmp.eq.s32.totalorder %v324_v36, %v1407_v7  ;;  %vm357_vm11 = vcmp.eq.s32.totalorder %v324_v36, %v1405_v6 }
  0x6c   : > { %942 = vmatpush.msk.msra.mxu0 %vm344_vm12, %v1215_v12  ;;  %974 = vmatpush.msk.msra.mxu2 %vm441_vm13, %v1215_v12  ;;  %vm340_vm12 = vcmp.eq.s32.totalorder %v1395_v1, %v1405_v6  ;;  %vm437_vm13 = vcmp.eq.s32.totalorder %v1395_v1, %v1407_v7 }
  0x6d   : > { %990 = vmatpush.msk.msra.mxu3 %vm457_vm14, %v1215_v12  ;;  %958 = vmatpush.msk.msra.mxu1 %vm360_vm15, %v1215_v12  ;;  %vm453_vm14 = vcmp.eq.s32.totalorder %v323_v39, %v1407_v7  ;;  %vm356_vm15 = vcmp.eq.s32.totalorder %v323_v39, %v1405_v6 }
  0x6e   : > { %943 = vmatpush.msk.msra.mxu0 %vm343_vm0, %v1215_v12  ;;  %975 = vmatpush.msk.msra.mxu2 %vm440_vm1, %v1215_v12  ;;  %vm627_vm0 = vcmask 60416  }
  0x6f   : > { %991 = vmatpush.msk.msra.mxu3 %vm456_vm2, %v1215_v12  ;;  %959 = vmatpush.msk.msra.mxu1 %vm359_vm3, %v1215_v12  ;;  %vm698_vm3 = vcmask 57344  }
  0x70   : > { %944 = vmatpush.msk.msra.mxu0 %vm342_vm4, %v1215_v12  ;;  %976 = vmatpush.msk.msra.mxu2 %vm439_vm5, %v1215_v12 }
  0x71   : > { %992 = vmatpush.msk.msra.mxu3 %vm455_vm6, %v1215_v12  ;;  %960 = vmatpush.msk.msra.mxu1 %vm358_vm7, %v1215_v12 }
  0x72   : > { %945 = vmatpush.msk.msra.mxu0 %vm341_vm8, %v1215_v12  ;;  %977 = vmatpush.msk.msra.mxu2 %vm438_vm9, %v1215_v12 }
  0x73   : > { %993 = vmatpush.msk.msra.mxu3 %vm454_vm10, %v1215_v12  ;;  %961 = vmatpush.msk.msra.mxu1 %vm357_vm11, %v1215_v12 }
  0x74   : > { %946 = vmatpush.msk.msra.mxu0 %vm340_vm12, %v1215_v12  ;;  %978 = vmatpush.msk.msra.mxu2 %vm437_vm13, %v1215_v12 }
  0x75   : > { %994 = vmatpush.msk.msra.mxu3 %vm453_vm14, %v1215_v12  ;;  %601 = vmatmul.f32.vlgmr.msra.gmra.mxu2 %v581_v40 }
  0x76   : > { %621 = vmatmul.f32.vlgmr.msra.gmra.mxu3 %v582_v41  ;;  %962 = vmatpush.msk.msra.mxu1 %vm356_vm15, %v1215_v12 }
  0x77   : > { %555 = vmatmul.f32.vlgmr.msra.gmra.mxu0 %v535_v37  ;;  %575 = vmatmul.f32.vlgmr.msra.gmra.mxu1 %v536_v38 }
  0xf4   : > { %v556_v45 = vpop.f32.mrf.mxu0  ;;  %v576_v46 = vpop.f32.mrf.mxu1 }
  0xf5   : > { %v577_v47 = vadd.f32 %v576_v46, %v556_v45 }
  0xf8   : > { %v602_v42 = vpop.f32.mrf.mxu2 }
  0xf9   : > { %v622_v43 = vpop.f32.mrf.mxu3 }
  0xfa   : > { %v623_v44 = vadd.f32 %v622_v43, %v602_v42 }
  0xfc   : > { %677 = vrot.lane.b32.xlu1 %v623_v44, %s1216_s9  ;;  %639 = vrot.lane.b32.xlu0 %v623_v44, %s1217_s11  ;;  %v625_v48 = vsub.f32 %v577_v47, %v623_v44  ;;  %s1163_s11 = scalar_lea.hbm %s1668_s4, 2 }
  0xfd   : > { %p1165_p4 = scmp.lt.s32.totalorder %s1163_s11, %s1159_s12 }
  0xfe   : > { %v626_v49 = vmul.f32 %v625_v48, %v625_v48 }
  0xff   : > { %p1166_p5 = por %p1165_p4, %p1164_p3 }
 0x100   : > { %v628_v50 = vsel %vm627_vm0, %v626_v49, 0.0 }
 0x101   : > { %p1167_p13 = pnand %p1166_p5, %p1162_p2 }
 0x104   : > { %658 = vrot.lane.b32.xlu0 %v623_v44, %s1218_s6 }
 0x126   : > { %629 = vadd.xlane.f32.xlu1 %v628_v50 }
 0x16e   : > { %v678_v51 = vpop.permute.xlu1 %677  ;;  %v640_v52 = vpop.permute.xlu0 %639 }
 0x16f   : > { %v680_v53 = vsub.f32 %v577_v47, %v678_v51  ;;  %v642_v54 = vsub.f32 %v577_v47, %v640_v52 }
 0x171   : > { %v681_v55 = vmul.f32 %v680_v53, %v680_v53  ;;  %v643_v56 = vmul.f32 %v642_v54, %v642_v54 }
 0x173   : > { %v682_v57 = vsel %vm627_vm0, %v681_v55, 0.0  ;;  %v644_v58 = vsel %vm627_vm0, %v643_v56, 0.0 }
 0x174   : > { %v683_v59 = vrot.slane %v682_v57, 4  ;;  %v645_v60 = vrot.slane %v644_v58, 4 }
 0x176   : > { %v684_v61 = vadd.f32 %v683_v59, %v682_v57  ;;  %v646_v62 = vadd.f32 %v645_v60, %v644_v58  ;;  %v659_v63 = vpop.permute.xlu0 %658 }
 0x177   : > { %v661_v0 = vsub.f32 %v577_v47, %v659_v63 }
 0x178   : > { %v685_v1 = vrot.slane %v684_v61, 2  ;;  %v647_v2 = vrot.slane %v646_v62, 2 }
 0x179   : > { %v662_v3 = vmul.f32 %v661_v0, %v661_v0 }
 0x17a   : > { %v648_v4 = vadd.f32 %v647_v2, %v646_v62  ;;  %v686_v6 = vadd.f32 %v685_v1, %v684_v61 }
 0x17b   : > { %v663_v5 = vsel %vm627_vm0, %v662_v3, 0.0 }
 0x17c   : > { %v664_v7 = vrot.slane %v663_v5, 4  ;;  %v649_v8 = vrot.slane %v648_v4, 1  ;;  %v687_v10 = vrot.slane %v686_v6, 1 }
 0x17e   : > { %v665_v9 = vadd.f32 %v664_v7, %v663_v5  ;;  %v650_v12 = vadd.f32 %v649_v8, %v648_v4  ;;  %v688_v15 = vadd.f32 %v687_v10, %v686_v6 }
 0x180   : > { %v666_v11 = vrot.slane %v665_v9, 2  ;;  %v651_v17 = vsub.f32 0.5, %v650_v12  ;;  %v689_v19 = vsub.f32 0.5, %v688_v15 }
 0x182   : > { %v667_v13 = vadd.f32 %v666_v11, %v665_v9  ;;  %v652_v20 = vmax.f32 %v651_v17, 0.0  ;;  %v690_v23 = vmax.f32 %v689_v19, 0.0  ;;  %vm654_vm2 = vcmp.gt.f32.partialorder %v651_v17, 0.0 }
 0x183   : > { %v995_v27 = vsel %vm654_vm2, 1.0, %v1219_v24  ;;  %vm692_vm4 = vcmp.gt.f32.partialorder %v689_v19, 0.0 }
 0x184   : > { %v668_v14 = vrot.slane %v667_v13, 1  ;;  %v997_v30 = vsel %vm692_vm4, 1.0, %v1219_v24 }
 0x186   : > { %v669_v16 = vadd.f32 %v668_v14, %v667_v13 }
 0x188   : > { %v670_v18 = vsub.f32 0.5, %v669_v16 }
 0x18a   : > { %v671_v21 = vmax.f32 %v670_v18, 0.0  ;;  %vm673_vm1 = vcmp.gt.f32.partialorder %v670_v18, 0.0 }
 0x18b   : > { %v996_v25 = vsel %vm673_vm1, 1.0, %v1219_v24 }
 0x18c   : > { %v672_v22 = vadd.f32 %v671_v21, %v652_v20  ;;  %v676_v29 = vadd.f32 %v996_v25, %v995_v27 }
 0x18e   : > { %v691_v26 = vadd.f32 %v690_v23, %v672_v22  ;;  %v695_v31 = vadd.f32 %v997_v30, %v676_v29 }
 0x190   : > { %v699_v28 = vsel %vm698_vm3, %v691_v26, 0.0  ;;  %v711_v32 = vsel %vm698_vm3, %v695_v31, 0.0 }
 0x191   : > { %700 = vadd.xlane.f32.xlu2 %v699_v28 }
 0x199   : > { %712 = vadd.xlane.f32.xlu2 %v711_v32  ;;  %v630_v33 = vpop.xlane.xlu1 %629 }
 0x19a   : > { %v631_v34 = vrot.slane %v630_v33, 4 }
 0x19c   : > { %v632_v35 = vadd.f32 %v631_v34, %v630_v33 }
 0x19e   : > { %v633_v36 = vrot.slane %v632_v35, 2 }
 0x1a0   : > { %v634_v37 = vadd.f32 %v633_v36, %v632_v35 }
 0x1a2   : > { %v635_v38 = vrot.slane %v634_v37, 1 }
 0x1a4   : > { %v636_v39 = vadd.f32 %v635_v38, %v634_v37 }
 0x1a6   : > { %1003 = vpush %v636_v39 }
 0x1d7   : > { %s1004_s20 = spop %1003 }
 0x1d8   : > { %697 = sst [smem:[%s1623_s7]] %s1004_s20 }
 0x204   : > { %v701_v40 = vpop.xlane.xlu2 %700 }
 0x205   : > { %v702_v41 = vrot.slane %v701_v40, 4 }
 0x207   : > { %v703_v42 = vadd.f32 %v702_v41, %v701_v40 }
 0x209   : > { %v704_v43 = vrot.slane %v703_v42, 2 }
 0x20b   : > { %v705_v44 = vadd.f32 %v704_v43, %v703_v42 }
 0x20c   : > { %v713_v45 = vpop.xlane.xlu2 %712 }
 0x20d   : > { %v714_v46 = vrot.slane %v713_v45, 4  ;;  %v706_v47 = vrot.slane %v705_v44, 1 }
 0x20f   : > { %v715_v48 = vadd.f32 %v714_v46, %v713_v45  ;;  %v707_v49 = vadd.f32 %v706_v47, %v705_v44 }
 0x211   : > { %v716_v50 = vrot.slane %v715_v48, 2  ;;  %1005 = vpush %v707_v49 }
 0x213   : > { %v717_v51 = vadd.f32 %v716_v50, %v715_v48 }
 0x215   : > { %v718_v52 = vrot.slane %v717_v51, 1 }
 0x217   : > { %v719_v53 = vadd.f32 %v718_v52, %v717_v51 }
 0x219   : > { %1007 = vpush %v719_v53 }
 0x242   : > { %s1006_s28 = spop %1005 }
 0x243   : > { %710 = sst [smem:[%s709_s8]] %s1006_s28 }
 0x24a   : > { %s1008_s14 = spop %1007 }
 0x24b   : > { %722 = sst [smem:[%s721_s13]] %s1008_s14 }
 0x24c   : > { %1170 = shalt.err (!%p1167_p13)
}
 0x24d   : > { %1015 = dma.smem_to_hbm (%p1290_p10), %s1623_s7, 16, %s736_s5, %s724_s23  }
 0x24e PF: > { %742 = sbr.rel (%p1027_p9) target bundleno = 598 (0x256), region = 56  ;;  %s747_s19 = sand.u32 (!%p1027_p9), 1, %s1201_s15  }
 0x24f   : > { %s748_s1 = scalar_lea.sflag (!%p1027_p9), [#allocation4], %s747_s19 }
 0x253   : > { %1196 = dma.done.wait (%p1294_p11), %s748_s1, 16  }
 0x254   : > { %1198 = vsyncadd (%p1294_p11), %s748_s1, 4294967280 }
 0x255   : > { %754 = sfence }
 0x256 PF: > { %s1677_s26 = sld [smem:[#allocation12_spill]]  ;;  %p20_p10 = scmp.ge.s32.totalorder %s1270_s21, 4  }
 0x257   : > { %s1678_s15 = smov %s1205_s16  ;;  %s1679_s16 = smov %s1209_s17 }
 0x258   : > { %s1681_s18 = smov %s1270_s21  ;;  %22 = sbr.rel (!%p20_p10) target bundleno = 9 (0x9), region = 111 }
 0x25c   : > { %s1680_s17 = smov %s1677_s26 }
 0x25d   :  { %755 = vsyncpa [#allocation3], 1 }
 0x25e   :  { %757 = vsyncpa [#allocation3 + $0x1], 1 }
 0x25f   :  { %758 = vsyncpa [#allocation6], 1 }
 0x260   :  { %760 = vsyncpa [#allocation6 + $0x1], 1 }
 0x261   :  { %761 = vsyncpa [#allocation4], 1 }
 0x262   :  { %763 = vsyncpa [#allocation4 + $0x1], 1 }

</bundles_post_ra>
